<compile_context>
chip_gen: v5e
topology: v5e:2x2
jax: 0.10.0
libtpu: 0.0.40
codegen_flags: <defaults>
</compile_context>

<pallas_src>
import jax
import jax.numpy as jnp
from jax import lax
from jax.experimental import pallas as pl
from jax.experimental.pallas import tpu as pltpu


def _sigmoid(v):
    # Exact elementwise sigmoid; exp goes to the EUP, the rest to the VPU.
    return 1.0 / (1.0 + jnp.exp(-v))


def gru_kernel(x_ref, h0_ref, w_ih_ref, w_hh_ref, b_ih_ref, b_hh_ref,
               out_ref, state_ref, h_scr):
    """One GRU timestep for one batch tile.

    Grid = (batch_blocks, seq_len); time is the innermost ("arbitrary") axis so
    h_scr validly carries h_{t-1} across grid steps within a batch block.
    """
    t = pl.program_id(1)
    hp = h_scr.shape[-1]                      # padded hidden size (multiple of 128)

    @pl.when(t == 0)
    def _():
        h_scr[...] = h0_ref[...].astype(jnp.float32)

    h_prev = h_scr[...]                       # (Bb, Hp) f32
    x_t = x_ref[0]                            # (Bb, Inp) matmul dtype

    # PyTorch weight layout (3H, in): contract over the last dim of BOTH
    # operands (i.e. x @ W^T) -> no transpose needed anywhere.
    dn = (((1,), (1,)), ((), ()))
    gi = lax.dot_general(x_t, w_ih_ref[...], dn,
                         preferred_element_type=jnp.float32) + b_ih_ref[...]
    gh = lax.dot_general(h_prev.astype(w_hh_ref.dtype), w_hh_ref[...], dn,
                         preferred_element_type=jnp.float32) + b_hh_ref[...]

    # Gate order [reset | update | new]; slices are 128-lane aligned (hp % 128 == 0).
    r = _sigmoid(gi[:, 0 * hp:1 * hp] + gh[:, 0 * hp:1 * hp])
    z = _sigmoid(gi[:, 1 * hp:2 * hp] + gh[:, 1 * hp:2 * hp])
    n = jnp.tanh(gi[:, 2 * hp:3 * hp] + r * gh[:, 2 * hp:3 * hp])
    h_new = (1.0 - z) * n + z * h_prev        # f32 epilogue (v5e has no bf16 VPU)

    h_scr[...] = h_new
    out_ref[0] = h_new.astype(out_ref.dtype)
    state_ref[...] = h_new.astype(state_ref.dtype)


def _round_up(n, m):
    return (n + m - 1) // m * m


def _pad_gate_weight(w, rows_pad, cols_pad):
    """(3*H, C) -> (3*rows_pad, cols_pad); each gate block padded separately."""
    parts = jnp.split(w, 3, axis=0)
    parts = [jnp.pad(p, ((0, rows_pad - p.shape[0]), (0, cols_pad - p.shape[1])))
             for p in parts]
    return jnp.concatenate(parts, axis=0)


def _pad_gate_bias(b, rows_pad):
    parts = jnp.split(b, 3)
    parts = [jnp.pad(p, (0, rows_pad - p.shape[0])) for p in parts]
    return jnp.concatenate(parts).reshape(1, 3 * rows_pad)


def gru_controller(x, prev_state, w_ih, w_hh, b_ih, b_hh, *,
                   matmul_dtype=jnp.bfloat16, block_b=None):
    """Single-layer GRU forward, PyTorch nn.GRU semantics (seq-first).

    x:          (T, B, input_size)
    prev_state: (1, B, H)
    w_ih:       (3*H, input_size), w_hh: (3*H, H)   (gate order [r|z|n])
    b_ih, b_hh: (3*H,)
    returns (out, state) with shapes (T, B, H) and (1, B, H).
    """
    T, B, In = x.shape
    H = w_hh.shape[1]
    out_dtype = x.dtype

    # Lane-dense padding (exact): padded weight rows/cols and bias entries are
    # zero, padded h lanes start at 0 and remain 0 through the recurrence.
    Hp = _round_up(H, 128)
    Inp = _round_up(In, 128)

    # bf16 matmul operands, f32 biases (accumulation/epilogue stay f32 in-kernel).
    w_ih_p = _pad_gate_weight(w_ih, Hp, Inp).astype(matmul_dtype)   # (3Hp, Inp)
    w_hh_p = _pad_gate_weight(w_hh, Hp, Hp).astype(matmul_dtype)    # (3Hp, Hp)
    b_ih_p = _pad_gate_bias(b_ih, Hp).astype(jnp.float32)           # (1, 3Hp)
    b_hh_p = _pad_gate_bias(b_hh, Hp).astype(jnp.float32)           # (1, 3Hp)
    x_p = jnp.pad(x, ((0, 0), (0, 0), (0, Inp - In))).astype(matmul_dtype)
    h0_p = jnp.pad(prev_state[0], ((0, 0), (0, Hp - H))).astype(jnp.float32)

    # Batch tiling: multiple of 8 sublanes, capped so VMEM stays bounded for
    # large B; >=2 batch blocks lets the "parallel" axis use both v7x TCs.
    if block_b is None:
        block_b = min(B, 256) if B % 8 == 0 else B
    n_b = pl.cdiv(B, block_b)

    out_p, state_p = pl.pallas_call(
        gru_kernel,
        out_shape=(
            jax.ShapeDtypeStruct((T, B, Hp), out_dtype),
            jax.ShapeDtypeStruct((B, Hp), out_dtype),
        ),
        grid_spec=pltpu.PrefetchScalarGridSpec(
            num_scalar_prefetch=0,
            grid=(n_b, T),
            in_specs=[
                pl.BlockSpec((1, block_b, Inp), lambda b, t: (t, b, 0)),  # x_t
                pl.BlockSpec((block_b, Hp), lambda b, t: (b, 0)),         # h0
                pl.BlockSpec((3 * Hp, Inp), lambda b, t: (0, 0)),         # W_ih (resident)
                pl.BlockSpec((3 * Hp, Hp), lambda b, t: (0, 0)),          # W_hh (resident)
                pl.BlockSpec((1, 3 * Hp), lambda b, t: (0, 0)),           # b_ih
                pl.BlockSpec((1, 3 * Hp), lambda b, t: (0, 0)),           # b_hh
            ],
            out_specs=(
                pl.BlockSpec((1, block_b, Hp), lambda b, t: (t, b, 0)),   # out[t]
                pl.BlockSpec((block_b, Hp), lambda b, t: (b, 0)),         # final h
            ),
            scratch_shapes=[pltpu.VMEM((block_b, Hp), jnp.float32)],      # h carry
        ),
        compiler_params=pltpu.CompilerParams(
            dimension_semantics=("parallel", "arbitrary"),
        ),
    )(x_p, h0_p, w_ih_p, w_hh_p, b_ih_p, b_hh_p)

    out = out_p[:, :, :H]
    state = state_p[:, :H].reshape(1, B, H)
    return out, state


def init_state(batch_size, hidden_size, dtype=jnp.float32):
    # Mirrors GRUController.init_state (pure zeros; no kernel needed).
    return jnp.zeros((1, batch_size, hidden_size), dtype)


def gru_reference(x, prev_state, w_ih, w_hh, b_ih, b_hh):
    """Pure-JAX f32 reference of torch.nn.GRU (single layer)."""
    w_ir, w_iz, w_in = jnp.split(w_ih, 3, axis=0)
    w_hr, w_hz, w_hn = jnp.split(w_hh, 3, axis=0)
    b_ir, b_iz, b_in = jnp.split(b_ih, 3)
    b_hr, b_hz, b_hn = jnp.split(b_hh, 3)
    hi = jax.lax.Precision.HIGHEST
    h = prev_state[0]
    outs = []
    for t in range(x.shape[0]):
        xt = x[t]
        r = _sigmoid(jnp.dot(xt, w_ir.T, precision=hi) + b_ir +
                     jnp.dot(h, w_hr.T, precision=hi) + b_hr)
        z = _sigmoid(jnp.dot(xt, w_iz.T, precision=hi) + b_iz +
                     jnp.dot(h, w_hz.T, precision=hi) + b_hz)
        n = jnp.tanh(jnp.dot(xt, w_in.T, precision=hi) + b_in +
                     r * (jnp.dot(h, w_hn.T, precision=hi) + b_hn))
        h = (1.0 - z) * n + z * h
        outs.append(h)
    return jnp.stack(outs, axis=0), h[None]


if __name__ == "__main__":
    key = jax.random.PRNGKey(0)
    k_x, k_h, k_wih, k_whh, k_bih, k_bhh = jax.random.split(key, 6)

    seq_len, batch, input_size, hidden_size = 8, 8, 16, 32

    x = jax.random.normal(k_x, (seq_len, batch, input_size), jnp.float32)
    # init_state() would be all-zeros; use a small random prev_state to
    # actually exercise the recurrent path.
    prev_state = 0.1 * jax.random.normal(k_h, (1, batch, hidden_size), jnp.float32)

    # PyTorch nn.GRU init: U(-1/sqrt(H), 1/sqrt(H)) for all weights and biases.
    bound = 1.0 / (hidden_size ** 0.5)
    w_ih = jax.random.uniform(k_wih, (3 * hidden_size, input_size), jnp.float32, -bound, bound)
    w_hh = jax.random.uniform(k_whh, (3 * hidden_size, hidden_size), jnp.float32, -bound, bound)
    b_ih = jax.random.uniform(k_bih, (3 * hidden_size,), jnp.float32, -bound, bound)
    b_hh = jax.random.uniform(k_bhh, (3 * hidden_size,), jnp.float32, -bound, bound)

    ref_out, ref_state = gru_reference(x, prev_state, w_ih, w_hh, b_ih, b_hh)

    # f32-operand run: tight structural check of the gates/recurrence.
    out32, state32 = gru_controller(x, prev_state, w_ih, w_hh, b_ih, b_hh,
                                    matmul_dtype=jnp.float32)
    jax.block_until_ready((out32, state32))
    assert out32.shape == (seq_len, batch, hidden_size)
    assert state32.shape == (1, batch, hidden_size)
    assert jnp.allclose(out32, ref_out, atol=2e-3, rtol=0), "f32 out mismatch"
    assert jnp.allclose(state32, ref_state, atol=2e-3, rtol=0), "f32 state mismatch"

    # Default bf16-operand / f32-accumulate run (MXU-friendly path).
    out, state = gru_controller(x, prev_state, w_ih, w_hh, b_ih, b_hh)
    jax.block_until_ready((out, state))
    assert out.shape == (seq_len, batch, hidden_size)
    assert state.shape == (1, batch, hidden_size)
    assert jnp.allclose(out, ref_out, atol=6e-2, rtol=0), "bf16 out mismatch"
    assert jnp.allclose(state, ref_state, atol=6e-2, rtol=0), "bf16 state mismatch"

    print("KERNEL_OK")
</pallas_src>

<mosaic_0001>
module attributes {stable_mosaic.version = 11 : i64} {
  func.func @gru_kernel(%arg0: i32, %arg1: i32, %arg2: memref<1x8x128xf32, #tpu.memory_space<vmem>>, %arg3: memref<8x128xf32, #tpu.memory_space<vmem>>, %arg4: memref<384x128xf32, #tpu.memory_space<vmem>>, %arg5: memref<384x128xf32, #tpu.memory_space<vmem>>, %arg6: memref<1x384xf32, #tpu.memory_space<vmem>>, %arg7: memref<1x384xf32, #tpu.memory_space<vmem>>, %arg8: memref<1x8x128xf32, #tpu.memory_space<vmem>>, %arg9: memref<8x128xf32, #tpu.memory_space<vmem>>, %arg10: memref<8x128xf32, #tpu.memory_space<vmem>>) attributes {dimension_semantics = [#tpu.dimension_semantics<parallel>, #tpu.dimension_semantics<arbitrary>], iteration_bounds = array<i64: 1, 8>, scalar_prefetch = 0 : i64, scratch_operands = 1 : i64, tpu.core_type = #tpu.core_type<tc>, window_params = [{transform_indices = @transform_0, window_bounds = array<i64: 1, 8, 128>}, {transform_indices = @transform_1, window_bounds = array<i64: 8, 128>}, {pipeline_mode = #tpu.pipeline_mode<synchronous>, transform_indices = @transform_2, window_bounds = array<i64: 384, 128>}, {pipeline_mode = #tpu.pipeline_mode<synchronous>, transform_indices = @transform_3, window_bounds = array<i64: 384, 128>}, {pipeline_mode = #tpu.pipeline_mode<synchronous>, transform_indices = @transform_4, window_bounds = array<i64: 1, 384>}, {pipeline_mode = #tpu.pipeline_mode<synchronous>, transform_indices = @transform_5, window_bounds = array<i64: 1, 384>}, {transform_indices = @transform_6, window_bounds = array<i64: 1, 8, 128>}, {transform_indices = @transform_7, window_bounds = array<i64: 8, 128>}]} {
    %c0_i32 = arith.constant 0 : i32
    %0 = arith.cmpi eq, %arg1, %c0_i32 : i32
    %1 = arith.extui %0 : i1 to i32
    %c0_i32_0 = arith.constant 0 : i32
    %2 = arith.cmpi ne, %1, %c0_i32_0 : i32
    scf.if %2 {
      %c0_28 = arith.constant 0 : index
      %c0_29 = arith.constant 0 : index
      %51 = vector.load %arg3[%c0_28, %c0_29] : memref<8x128xf32, #tpu.memory_space<vmem>>, vector<8x128xf32>
      %c0_30 = arith.constant 0 : index
      %c0_31 = arith.constant 0 : index
      %52 = vector.load %arg10[%c0_30, %c0_31] : memref<8x128xf32, #tpu.memory_space<vmem>>, vector<8x128xf32>
      tpu.vector_store %arg10[%c0_30, %c0_31], %51 {strides = array<i32>} : memref<8x128xf32, #tpu.memory_space<vmem>>, vector<8x128xf32>,
    } else {
    }
    %c0 = arith.constant 0 : index
    %c0_1 = arith.constant 0 : index
    %3 = vector.load %arg10[%c0, %c0_1] : memref<8x128xf32, #tpu.memory_space<vmem>>, vector<8x128xf32>
    %c0_2 = arith.constant 0 : index
    %c0_3 = arith.constant 0 : index
    %c0_4 = arith.constant 0 : index
    %4 = vector.load %arg2[%c0_2, %c0_3, %c0_4] : memref<1x8x128xf32, #tpu.memory_space<vmem>>, vector<1x8x128xf32>
    %5 = vector.shape_cast %4 : vector<1x8x128xf32> to vector<8x128xf32>
    %c0_5 = arith.constant 0 : index
    %c0_6 = arith.constant 0 : index
    %6 = vector.load %arg4[%c0_5, %c0_6] : memref<384x128xf32, #tpu.memory_space<vmem>>, vector<384x128xf32>
    %cst = arith.constant dense<0.000000e+00> : vector<8x384xf32>
    %7 = tpu.matmul %5, %6, %cst {dimension_numbers = #tpu.dot_dimension_numbers<[1], [1], [0], [0], [0, 0, 1, 0], [], []>} : vector<8x128xf32>, vector<384x128xf32>, vector<8x384xf32> -> vector<8x384xf32>
    %c0_7 = arith.constant 0 : index
    %c0_8 = arith.constant 0 : index
    %8 = vector.load %arg6[%c0_7, %c0_8] : memref<1x384xf32, #tpu.memory_space<vmem>>, vector<1x384xf32>
    %9 = vector.broadcast %8 : vector<1x384xf32> to vector<8x384xf32>
    %10 = arith.addf %7, %9 : vector<8x384xf32>
    %c0_9 = arith.constant 0 : index
    %c0_10 = arith.constant 0 : index
    %11 = vector.load %arg5[%c0_9, %c0_10] : memref<384x128xf32, #tpu.memory_space<vmem>>, vector<384x128xf32>
    %cst_11 = arith.constant dense<0.000000e+00> : vector<8x384xf32>
    %12 = tpu.matmul %3, %11, %cst_11 {dimension_numbers = #tpu.dot_dimension_numbers<[1], [1], [0], [0], [0, 0, 1, 0], [], []>} : vector<8x128xf32>, vector<384x128xf32>, vector<8x384xf32> -> vector<8x384xf32>
    %c0_12 = arith.constant 0 : index
    %c0_13 = arith.constant 0 : index
    %13 = vector.load %arg7[%c0_12, %c0_13] : memref<1x384xf32, #tpu.memory_space<vmem>>, vector<1x384xf32>
    %14 = vector.broadcast %13 : vector<1x384xf32> to vector<8x384xf32>
    %15 = arith.addf %12, %14 : vector<8x384xf32>
    %16 = vector.extract_strided_slice %10 {offsets = [0, 0], sizes = [8, 128], strides = [1, 1]} : vector<8x384xf32> to vector<8x128xf32>
    %17 = vector.extract_strided_slice %15 {offsets = [0, 0], sizes = [8, 128], strides = [1, 1]} : vector<8x384xf32> to vector<8x128xf32>
    %18 = arith.addf %16, %17 : vector<8x128xf32>
    %cst_14 = arith.constant 0.000000e+00 : f32
    %19 = vector.broadcast %cst_14 : f32 to vector<8x128xf32>
    %20 = arith.subf %19, %18 : vector<8x128xf32>
    %21 = math.exp %20 : vector<8x128xf32>
    %cst_15 = arith.constant 1.000000e+00 : f32
    %22 = vector.broadcast %cst_15 : f32 to vector<8x128xf32>
    %23 = arith.addf %22, %21 : vector<8x128xf32>
    %cst_16 = arith.constant 1.000000e+00 : f32
    %24 = vector.broadcast %cst_16 : f32 to vector<8x128xf32>
    %25 = arith.divf %24, %23 : vector<8x128xf32>
    %26 = vector.extract_strided_slice %10 {offsets = [0, 128], sizes = [8, 128], strides = [1, 1]} : vector<8x384xf32> to vector<8x128xf32>
    %27 = vector.extract_strided_slice %15 {offsets = [0, 128], sizes = [8, 128], strides = [1, 1]} : vector<8x384xf32> to vector<8x128xf32>
    %28 = arith.addf %26, %27 : vector<8x128xf32>
    %cst_17 = arith.constant 0.000000e+00 : f32
    %29 = vector.broadcast %cst_17 : f32 to vector<8x128xf32>
    %30 = arith.subf %29, %28 : vector<8x128xf32>
    %31 = math.exp %30 : vector<8x128xf32>
    %cst_18 = arith.constant 1.000000e+00 : f32
    %32 = vector.broadcast %cst_18 : f32 to vector<8x128xf32>
    %33 = arith.addf %32, %31 : vector<8x128xf32>
    %cst_19 = arith.constant 1.000000e+00 : f32
    %34 = vector.broadcast %cst_19 : f32 to vector<8x128xf32>
    %35 = arith.divf %34, %33 : vector<8x128xf32>
    %36 = vector.extract_strided_slice %10 {offsets = [0, 256], sizes = [8, 128], strides = [1, 1]} : vector<8x384xf32> to vector<8x128xf32>
    %37 = vector.extract_strided_slice %15 {offsets = [0, 256], sizes = [8, 128], strides = [1, 1]} : vector<8x384xf32> to vector<8x128xf32>
    %38 = arith.mulf %25, %37 : vector<8x128xf32>
    %39 = arith.addf %36, %38 : vector<8x128xf32>
    %40 = math.tanh %39 : vector<8x128xf32>
    %cst_20 = arith.constant 1.000000e+00 : f32
    %41 = vector.broadcast %cst_20 : f32 to vector<8x128xf32>
    %42 = arith.subf %41, %35 : vector<8x128xf32>
    %43 = arith.mulf %42, %40 : vector<8x128xf32>
    %44 = arith.mulf %35, %3 : vector<8x128xf32>
    %45 = arith.addf %43, %44 : vector<8x128xf32>
    %c0_21 = arith.constant 0 : index
    %c0_22 = arith.constant 0 : index
    %46 = vector.load %arg10[%c0_21, %c0_22] : memref<8x128xf32, #tpu.memory_space<vmem>>, vector<8x128xf32>
    tpu.vector_store %arg10[%c0_21, %c0_22], %45 {strides = array<i32>} : memref<8x128xf32, #tpu.memory_space<vmem>>, vector<8x128xf32>,
    %c0_23 = arith.constant 0 : index
    %c0_24 = arith.constant 0 : index
    %c0_25 = arith.constant 0 : index
    %47 = vector.load %arg8[%c0_23, %c0_24, %c0_25] : memref<1x8x128xf32, #tpu.memory_space<vmem>>, vector<1x8x128xf32>
    %48 = vector.shape_cast %47 : vector<1x8x128xf32> to vector<8x128xf32>
    %49 = vector.shape_cast %45 : vector<8x128xf32> to vector<1x8x128xf32>
    tpu.vector_store %arg8[%c0_23, %c0_24, %c0_25], %49 {strides = array<i32>} : memref<1x8x128xf32, #tpu.memory_space<vmem>>, vector<1x8x128xf32>,
    %c0_26 = arith.constant 0 : index
    %c0_27 = arith.constant 0 : index
    %50 = vector.load %arg9[%c0_26, %c0_27] : memref<8x128xf32, #tpu.memory_space<vmem>>, vector<8x128xf32>
    tpu.vector_store %arg9[%c0_26, %c0_27], %45 {strides = array<i32>} : memref<8x128xf32, #tpu.memory_space<vmem>>, vector<8x128xf32>,
    return
  }
  func.func @transform_0(%arg0: i32, %arg1: i32) -> (i32, i32, i32) {
    %c0_i32 = arith.constant 0 : i32
    %c0_i32_0 = arith.constant 0 : i32
    return %arg1, %arg0, %c0_i32 : i32, i32, i32
  }
  func.func @transform_1(%arg0: i32, %arg1: i32) -> (i32, i32) {
    %c0_i32 = arith.constant 0 : i32
    %c0_i32_0 = arith.constant 0 : i32
    return %arg0, %c0_i32 : i32, i32
  }
  func.func @transform_2(%arg0: i32, %arg1: i32) -> (i32, i32) {
    %c0_i32 = arith.constant 0 : i32
    %c0_i32_0 = arith.constant 0 : i32
    %c0_i32_1 = arith.constant 0 : i32
    return %c0_i32, %c0_i32_0 : i32, i32
  }
  func.func @transform_3(%arg0: i32, %arg1: i32) -> (i32, i32) {
    %c0_i32 = arith.constant 0 : i32
    %c0_i32_0 = arith.constant 0 : i32
    %c0_i32_1 = arith.constant 0 : i32
    return %c0_i32, %c0_i32_0 : i32, i32
  }
  func.func @transform_4(%arg0: i32, %arg1: i32) -> (i32, i32) {
    %c0_i32 = arith.constant 0 : i32
    %c0_i32_0 = arith.constant 0 : i32
    %c0_i32_1 = arith.constant 0 : i32
    return %c0_i32, %c0_i32_0 : i32, i32
  }
  func.func @transform_5(%arg0: i32, %arg1: i32) -> (i32, i32) {
    %c0_i32 = arith.constant 0 : i32
    %c0_i32_0 = arith.constant 0 : i32
    %c0_i32_1 = arith.constant 0 : i32
    return %c0_i32, %c0_i32_0 : i32, i32
  }
  func.func @transform_6(%arg0: i32, %arg1: i32) -> (i32, i32, i32) {
    %c0_i32 = arith.constant 0 : i32
    %c0_i32_0 = arith.constant 0 : i32
    return %arg1, %arg0, %c0_i32 : i32, i32, i32
  }
  func.func @transform_7(%arg0: i32, %arg1: i32) -> (i32, i32) {
    %c0_i32 = arith.constant 0 : i32
    %c0_i32_0 = arith.constant 0 : i32
    return %arg0, %c0_i32 : i32, i32
  }
}

</mosaic_0001>

<bundles_post_ra>
// kernel: tpu_custom_call.1
= control target key start
LH: loop header
LB: loop body
LE: loop exit
PB: predicated region body
PF: predicated region fallthrough
CT: control target
= control target key end

     0   :  { %s1504_s0 = inlined_call_operand.hbm [shape: f32[8,8,128], index: 0, kind: input, shape index: {}]   ;;  %s1505_s1 = inlined_call_operand.hbm [shape: f32[8,128], index: 1, kind: input, shape index: {}]   ;;  %s1506_s2 = inlined_call_operand.hbm [shape: f32[384,128], index: 2, kind: input, shape index: {}]   ;;  %s1507_s3 = inlined_call_operand.hbm [shape: f32[384,128], index: 3, kind: input, shape index: {}]   ;;  %s1508_s4 = inlined_call_operand.vmem [shape: f32[1,384], index: 4, kind: input, shape index: {}]   ;;  %s1509_s5 = inlined_call_operand.hbm [shape: f32[1,384], index: 5, kind: input, shape index: {}]   ;;  %s1510_s6 = inlined_call_operand.hbm [shape: f32[8,8,128], index: 6, kind: output, shape index: {0}]   ;;  %s1511_s7 = inlined_call_operand.hbm [shape: f32[8,128], index: 7, kind: output, shape index: {1}]  }
   0x1   :  { %1512 = sst [smem:[#allocation20_spill]] %s1505_s1 }
   0x2   :  { %1513 = sst [smem:[#allocation21_spill]] %s1506_s2 }
   0x3   :  { %1514 = sst [smem:[#allocation22_spill]] %s1507_s3 }
   0x4   :  { %13 = vsyncpa [#allocation4], 0 }
   0x5   :  { %15 = vsyncpa [#allocation4 + $0x1], 0 }
   0x6   :  { %16 = vsyncpa [#allocation7], 0 }
   0x7   :  { %17 = vsyncpa [#allocation10], 0 }
   0x8   :  { %18 = vsyncpa [#allocation5], 0 }
   0x9   :  { %20 = vsyncpa [#allocation5 + $0x1], 0 }
   0xa   :  { %21 = vsyncpa [#allocation14], 0  ;;  %s1308_s24 = smov 0   ;;  %s1310_s25 = smov 0  }
   0xb   :  { %s1312_s26 = smov 0   ;;  %s1314_s27 = smov 0  }
   0xc   :  { %s1316_s28 = smov 0   ;;  %s1318_s29 = smov 0  }
   0xd LB: > { %s841_s30 = sadd.s32 4294967295, %s1259_s29   ;;  %p843_p0 = scmp.ge.s32.totalorder %s1259_s29, 1  ;;  %s1259_s29 = sphi %s1318_s29, %s27_s29   ;;  %s1255_s28 = sphi %s1316_s28, %s1529_s28   ;;  %s1251_s27 = sphi %s1314_s27, %s1528_s27   ;;  %s1247_s26 = sphi %s1312_s26, %s1527_s26   ;;  %s1243_s25 = sphi %s1310_s25, %s1526_s25   ;;  %s1239_s24 = sphi %s1308_s24, %s1525_s24  }
   0xe   : > { %p1342_p1 = scmp.eq.s32.totalorder %s841_s30, 0  ;;  %p236_p2 = scmp.lt.s32.totalorder %s1259_s29, 9 }
   0xf   : > { %s1516_s1 = sld [smem:[#allocation20_spill]]  ;;  %s1261_s13 = smov [#allocation6]  }
  0x10   : > { %p1350_p3 = pnand %p843_p0, %p236_p2  ;;  %s252_s14 = sshll.u32 %s1261_s13, 4  ;;  %s253_s14 = int_to_ptr.vmem [resolvable:$true] %s252_s14 }
  0x11   : > { %s1519_s3 = sld [smem:[#allocation22_spill]]  ;;  %s1262_s19 = smov [#allocation9]  }
  0x12   : > { %p889_p4 = pneg %p1350_p3  ;;  %s277_s20 = sshll.u32 %s1262_s19, 4  ;;  %s278_s20 = int_to_ptr.vmem [resolvable:$true] %s277_s20 }
  0x13   : > { %s1520_s2 = sld [smem:[#allocation21_spill]]  ;;  %s1263_s9 = smov 128  }
  0x14   : > { %p1358_p5 = pnand %p889_p4, %p1342_p1  ;;  %s1264_s10 = smov 8  }
  0x15   : > { %s250_s11 = sshll.u32 %s1516_s1, 4  ;;  %s1265_s16 = smov [#allocation8]   ;;  %s251_s11 = int_to_ptr.hbm [resolvable:$true] %s250_s11 }
  0x16   : > { %892 = dma.hbm_to_vmem [thread:$0]  (!%p1358_p5), %s251_s11, 128, %s253_s14, [#allocation7]  }
  0x17   : > { %s275_s18 = sshll.u32 %s1519_s3, 4  ;;  %s293_s14 = sshll.u32 %s1509_s5, 4  ;;  %s276_s18 = int_to_ptr.hbm [resolvable:$true] %s275_s18  ;;  %s294_s14 = int_to_ptr.hbm [resolvable:$true] %s293_s14 }
  0x18   : > { %898 = dma.hbm_to_vmem [thread:$0]  (!%p1358_p5), %s276_s18, 6144, %s278_s20, [#allocation10], %s1263_s9, %s1263_s9, %s1264_s10  }
  0x19   : > { %s261_s23 = sshll.u32 %s1520_s2, 4  ;;  %s263_s17 = sshll.u32 %s1265_s16, 4  ;;  %s262_s23 = int_to_ptr.hbm [resolvable:$true] %s261_s23  ;;  %s264_s17 = int_to_ptr.vmem [resolvable:$true] %s263_s17 }
  0x1a   : > { %895 = dma.hbm_to_vmem [thread:$0]  (!%p1358_p5), %s262_s23, 6144, %s264_s17, [#allocation7], %s1263_s9, %s1263_s9, %s1264_s10  }
  0x1b   : > { %s1266_s19 = smov [#allocation11]   ;;  %s36_s18 = sadd.s32 1, %s1255_s28 }
  0x1c   : > { %s295_s21 = sshll.u32 %s1266_s19, 4  ;;  %s842_s20 = sadd.s32 4294967294, %s1259_s29   ;;  %s296_s21 = int_to_ptr.vmem [resolvable:$true] %s295_s21 }
  0x1d   : > { %901 = dma.hbm_to_vmem [thread:$0]  (!%p1358_p5), %s294_s14, 48, %s296_s21, [#allocation10]  }
  0x1e   : > { %p37_p6 = scmp.ge.s32.totalorder %s36_s18, 8  ;;  %s48_s22 = sadd.s32 1, %s1247_s26 }
  0x1f   : > { %p55_p7 = scmp.ne.s32.totalorder %s1247_s26, %s1243_s25  ;;  %p56_p8 = scmp.eq.s32.totalorder %s1259_s29, 0 }
  0x20   : > { %s1531_s18 = smov (%p37_p6, %s36_s18), 0  ;;  %p61_p9 = scmp.ne.s32.totalorder %s1243_s25, %s1239_s24 }
  0x21   : > { %s43_s23 = ssub.s32 %s1255_s28, %s1531_s18  ;;  %p1393_p10 = scmp.eq.s32.totalorder %s841_s30, 7 }
  0x22   : > { %p46_p11 = scmp.eq.s32.totalorder %s43_s23, 0  ;;  %p1399_p12 = por %p1342_p1, %p61_p9 }
  0x23   : > { %p1405_p13 = por %p1393_p10, %p55_p7  ;;  %p203_p0 = scmp.eq.s32.totalorder %s842_s20, 7 }
  0x24   : > { %s1410_s13 = scalar_select %p46_p11, %s1247_s26, %s48_s22  }
  0x25   : > { %p57_p2 = por %p56_p8, %p55_p7  ;;  %p1412_p4 = por %p203_p0, %p61_p9 }
  0x26   : > { %s306_s11 = sand.u32 1, %s1247_s26   ;;  %s850_s14 = sshll.u32 %s1255_s28, 3 }
  0x27   : > { %p914_p5 = scmp.lt.s32.totalorder %s1259_s29, 8  ;;  %s849_s16 = sshll.u32 %s306_s11, 3 }
  0x28   : > { %s315_s21 = scalar_lea.hbm %s1504_s0, %s850_s14  ;;  %s310_s1 = scalar_lea.vmem [#allocation3], %s849_s16 }
  0x29   : > { %s317_s23 = sshll.u32 %s315_s21, 4  ;;  %s319_s2 = sshll.u32 %s310_s1, 4  ;;  %s318_s23 = int_to_ptr.hbm [resolvable:$true] %s317_s23  ;;  %s320_s2 = int_to_ptr.vmem [resolvable:$true] %s319_s2 }
  0x2a   : > { %p903_p6 = pnand %p914_p5, %p57_p2  ;;  %s307_s20 = scalar_lea.sflag [#allocation4], %s306_s11 }
  0x2b   : > { %328 = sbr.rel (%p1350_p3) target bundleno = 363 (0x16b), region = 44  ;;  %s1425_s22 = sand.u32 (!%p1350_p3), 1, %s1243_s25  }
  0x2c   : > { %905 = dma.hbm_to_vmem [thread:$0]  (!%p903_p6), %s318_s23, 128, %s320_s2, %s307_s20  }
  0x2d   : > { %s852_s3 = sshll.u32 (!%p1350_p3), %s1425_s22, 3  ;;  %s331_s17 = scalar_lea.sflag (!%p1350_p3), [#allocation4], %s1425_s22 }
  0x2e   : > { %s1429_s14 = scalar_lea.vmem (!%p1350_p3), [#allocation3], %s852_s3 }
  0x30   : > { %1218 = dma.done.wait (%p1399_p12), %s331_s17, 128  }
  0x31   : > { %1220 = vsyncadd (%p1399_p12), %s331_s17, 4294967168 }
  0x32   : > { %1222 = dma.done.wait (%p1342_p1), [#allocation7], 6272  }
  0x33   : > { %1224 = vsyncadd (%p1342_p1), [#allocation7], 4294961024 }
  0x34   : > { %1226 = dma.done.wait (%p1342_p1), [#allocation10], 6192  }
  0x35   : > { %1228 = vsyncadd (%p1342_p1), [#allocation10], 4294961104  ;;  %s1443_s1 = scalar_lea.vmem [#allocation12], %s852_s3  ;;  %p858_p3 = scmp.ne.s32.totalorder %s1251_s27, 0 }
  0x37   : > { %389 = sbr.rel (%p858_p3) target bundleno = 62 (0x3e), region = 68 }
  0x3c   : > { %v390_v0 = vld [vmem:[#allocation6] sm:$0xff] }
  0x3d   : > { %391 = vst [vmem:[#allocation2] sm:$0xff] %v390_v0 }
  0x3e PF: > { %v409_v1 = vld [vmem:[#allocation8 + $0x78] sm:$0xff]  ;;  %v408_v3 = vld [vmem:[#allocation8 + $0x70] sm:$0xff]  ;;  %v407_v6 = vld [vmem:[#allocation8 + $0x68] sm:$0xff]  ;;  %s860_s8 = sshll.u32 %s1251_s27, 3  ;;  %s690_s16 = sshll.u32 %s1443_s1, 4  ;;  %s691_s16 = int_to_ptr.vmem [resolvable:$true] %s690_s16 }
  0x3f   : > { %450 = vmatpush.xpose.msra.mxu0 %v409_v1  ;;  %v425_v2 = vld [vmem:[#allocation8 + $0xf8] sm:$0xff]  ;;  %v424_v4 = vld [vmem:[#allocation8 + $0xf0] sm:$0xff]  ;;  %v423_v7 = vld [vmem:[#allocation8 + $0xe8] sm:$0xff]  ;;  %s688_s11 = scalar_lea.hbm %s1510_s6, %s860_s8  ;;  %s1267_s27 = smov [#allocation13]  }
  0x40   : > { %470 = vmatpush.xpose.msra.mxu1 %v425_v2  ;;  %v525_v5 = vld [vmem:[#allocation9 + $0x78] sm:$0xff]  ;;  %v524_v8 = vld [vmem:[#allocation9 + $0x70] sm:$0xff]  ;;  %v406_v9 = vld [vmem:[#allocation8 + $0x60] sm:$0xff]  ;;  %s692_s19 = sshll.u32 %s688_s11, 4  ;;  %s704_s21 = sshll.u32 %s1267_s27, 4  ;;  %s693_s19 = int_to_ptr.hbm [resolvable:$true] %s692_s19  ;;  %s705_s21 = int_to_ptr.vmem [resolvable:$true] %s704_s21 }
  0x41   : > { %566 = vmatpush.xpose.msra.mxu3 %v525_v5  ;;  %v422_v10 = vld [vmem:[#allocation8 + $0xe0] sm:$0xff]  ;;  %v523_v11 = vld [vmem:[#allocation9 + $0x68] sm:$0xff]  ;;  %v405_v12 = vld [vmem:[#allocation8 + $0x58] sm:$0xff]  ;;  %s706_s17 = sshll.u32 %s1511_s7, 4  ;;  %s1151_s2 = sshra.s32 %s693_s19, 4  ;;  %s707_s17 = int_to_ptr.hbm [resolvable:$true] %s706_s17  ;;  %s1152_s2 = int_to_ptr.hbm [resolvable:$true] %s1151_s2 }
  0x42   : > { %v421_v13 = vld [vmem:[#allocation8 + $0xd8] sm:$0xff]  ;;  %v522_v14 = vld [vmem:[#allocation9 + $0x60] sm:$0xff]  ;;  %v404_v15 = vld [vmem:[#allocation8 + $0x50] sm:$0xff]  ;;  %s1153_s3 = scalar_lea.hbm %s1152_s2, 8  ;;  %s1157_s15 = scalar_lea.hbm %s1510_s6, 64 }
  0x43   : > { %451 = vmatpush.xpose.msra.mxu0 %v408_v3  ;;  %v420_v16 = vld [vmem:[#allocation8 + $0xd0] sm:$0xff]  ;;  %v521_v17 = vld [vmem:[#allocation9 + $0x58] sm:$0xff]  ;;  %v403_v18 = vld [vmem:[#allocation8 + $0x48] sm:$0xff]  ;;  %p1154_p1 = scmp.ne.s32.totalorder %s1152_s2, %s1153_s3  ;;  %p1158_p9 = scmp.lt.s32.totalorder %s1152_s2, %s1510_s6 }
  0x44   : > { %471 = vmatpush.xpose.msra.mxu1 %v424_v4  ;;  %v419_v19 = vld [vmem:[#allocation8 + $0xc8] sm:$0xff]  ;;  %v520_v20 = vld [vmem:[#allocation9 + $0x50] sm:$0xff]  ;;  %v402_v21 = vld [vmem:[#allocation8 + $0x40] sm:$0xff]  ;;  %p1159_p11 = scmp.lt.s32.totalorder %s1157_s15, %s1153_s3 }
  0x45   : > { %567 = vmatpush.xpose.msra.mxu3 %v524_v8  ;;  %v418_v22 = vld [vmem:[#allocation8 + $0xc0] sm:$0xff]  ;;  %v519_v23 = vld [vmem:[#allocation9 + $0x48] sm:$0xff]  ;;  %v401_v24 = vld [vmem:[#allocation8 + $0x38] sm:$0xff]  ;;  %p1155_p7 = pnand %p1154_p1, %p1405_p13 }
  0x46   : > { %v417_v25 = vld [vmem:[#allocation8 + $0xb8] sm:$0xff]  ;;  %v518_v26 = vld [vmem:[#allocation9 + $0x40] sm:$0xff]  ;;  %v400_v27 = vld [vmem:[#allocation8 + $0x30] sm:$0xff]  ;;  %p1160_p12 = por %p1159_p11, %p1158_p9 }
  0x47   : > { %452 = vmatpush.xpose.msra.mxu0 %v407_v6  ;;  %v441_v28 = vld [vmem:[#allocation8 + $0x178] sm:$0xff]  ;;  %v416_v29 = vld [vmem:[#allocation8 + $0xb0] sm:$0xff]  ;;  %v399_v31 = vld [vmem:[#allocation8 + $0x28] sm:$0xff]  ;;  %p1156_p8 = pneg %p1155_p7 }
  0x48   : > { %472 = vmatpush.xpose.msra.mxu1 %v423_v7  ;;  %v517_v30 = vld [vmem:[#allocation9 + $0x38] sm:$0xff]  ;;  %490 = vmatpush.xpose.msra.mxu2 %v441_v28  ;;  %v440_v32 = vld [vmem:[#allocation8 + $0x170] sm:$0xff]  ;;  %v415_v33 = vld [vmem:[#allocation8 + $0xa8] sm:$0xff] }
  0x49   : > { %568 = vmatpush.xpose.msra.mxu3 %v523_v11  ;;  %v516_v34 = vld [vmem:[#allocation9 + $0x30] sm:$0xff]  ;;  %v398_v35 = vld [vmem:[#allocation8 + $0x20] sm:$0xff]  ;;  %v439_v36 = vld [vmem:[#allocation8 + $0x168] sm:$0xff]  ;;  %p1161_p0 = pnand %p1160_p12, %p1156_p8 }
  0x4a   : > { %v414_v37 = vld [vmem:[#allocation8 + $0xa0] sm:$0xff]  ;;  %v515_v38 = vld [vmem:[#allocation9 + $0x28] sm:$0xff]  ;;  %v397_v39 = vld [vmem:[#allocation8 + $0x18] sm:$0xff] }
  0x4b   : > { %453 = vmatpush.xpose.msra.mxu0 %v406_v9  ;;  %v438_v40 = vld [vmem:[#allocation8 + $0x160] sm:$0xff]  ;;  %v413_v41 = vld [vmem:[#allocation8 + $0x98] sm:$0xff]  ;;  %v396_v43 = vld [vmem:[#allocation8 + $0x10] sm:$0xff] }
  0x4c   : > { %473 = vmatpush.xpose.msra.mxu1 %v422_v10  ;;  %491 = vmatpush.xpose.msra.mxu2 %v440_v32  ;;  %v514_v42 = vld [vmem:[#allocation9 + $0x20] sm:$0xff]  ;;  %v437_v44 = vld [vmem:[#allocation8 + $0x158] sm:$0xff]  ;;  %v412_v45 = vld [vmem:[#allocation8 + $0x90] sm:$0xff] }
  0x4d   : > { %569 = vmatpush.xpose.msra.mxu3 %v522_v14  ;;  %v513_v46 = vld [vmem:[#allocation9 + $0x18] sm:$0xff]  ;;  %v395_v47 = vld [vmem:[#allocation8 + $0x8] sm:$0xff]  ;;  %v436_v48 = vld [vmem:[#allocation8 + $0x150] sm:$0xff] }
  0x4e   : > { %v411_v49 = vld [vmem:[#allocation8 + $0x88] sm:$0xff]  ;;  %v512_v50 = vld [vmem:[#allocation9 + $0x10] sm:$0xff]  ;;  %v394_v51 = vld [vmem:[#allocation8] sm:$0xff] }
  0x4f   : > { %454 = vmatpush.xpose.msra.mxu0 %v405_v12  ;;  %v435_v52 = vld [vmem:[#allocation8 + $0x148] sm:$0xff]  ;;  %v541_v53 = vld [vmem:[#allocation9 + $0xf8] sm:$0xff]  ;;  %v410_v54 = vld [vmem:[#allocation8 + $0x80] sm:$0xff] }
  0x50   : > { %474 = vmatpush.xpose.msra.mxu1 %v421_v13  ;;  %492 = vmatpush.xpose.msra.mxu2 %v439_v36  ;;  %v557_v55 = vld [vmem:[#allocation9 + $0x178] sm:$0xff]  ;;  %v511_v56 = vld [vmem:[#allocation9 + $0x8] sm:$0xff]  ;;  %v434_v57 = vld [vmem:[#allocation8 + $0x140] sm:$0xff] }
  0x51   : > { %570 = vmatpush.xpose.msra.mxu3 %v521_v17  ;;  %v540_v58 = vld [vmem:[#allocation9 + $0xf0] sm:$0xff]  ;;  %v510_v60 = vld [vmem:[#allocation9] sm:$0xff]  ;;  %v433_v61 = vld [vmem:[#allocation8 + $0x138] sm:$0xff] }
  0x52   : > { %v556_v59 = vld [vmem:[#allocation9 + $0x170] sm:$0xff]  ;;  %v539_v62 = vld [vmem:[#allocation9 + $0xe8] sm:$0xff]  ;;  %v1446_v63 = vld [vmem:[#allocation2] sm:$0xff] }
  0x53   : > { %455 = vmatpush.xpose.msra.mxu0 %v404_v15  ;;  %v555_v0 = vld [vmem:[#allocation9 + $0x168] sm:$0xff]  ;;  %v432_v2 = vld [vmem:[#allocation8 + $0x130] sm:$0xff]  ;;  %v538_v3 = vld [vmem:[#allocation9 + $0xe0] sm:$0xff] }
  0x54   : > { %475 = vmatpush.xpose.msra.mxu1 %v420_v16  ;;  %493 = vmatpush.xpose.msra.mxu2 %v438_v40  ;;  %v393_v1 = vld [vmem:[%s1429_s14] sm:$0xff]  ;;  %v554_v4 = vld [vmem:[#allocation9 + $0x160] sm:$0xff]  ;;  %v537_v6 = vld [vmem:[#allocation9 + $0xd8] sm:$0xff]  ;;  %s677_s14 = scalar_lea.sflag [#allocation5], %s1425_s22 }
  0x55   : > { %571 = vmatpush.xpose.msra.mxu3 %v520_v20  ;;  %v431_v5 = vld [vmem:[#allocation8 + $0x128] sm:$0xff]  ;;  %v553_v7 = vld [vmem:[#allocation9 + $0x158] sm:$0xff]  ;;  %v430_v8 = vld [vmem:[#allocation8 + $0x120] sm:$0xff] }
  0x56   : > { %v536_v9 = vld [vmem:[#allocation9 + $0xd0] sm:$0xff]  ;;  %v429_v11 = vld [vmem:[#allocation8 + $0x118] sm:$0xff]  ;;  %v535_v12 = vld [vmem:[#allocation9 + $0xc8] sm:$0xff] }
  0x57   : > { %456 = vmatpush.xpose.msra.mxu0 %v403_v18  ;;  %v552_v10 = vld [vmem:[#allocation9 + $0x150] sm:$0xff]  ;;  %v551_v13 = vld [vmem:[#allocation9 + $0x148] sm:$0xff]  ;;  %v534_v15 = vld [vmem:[#allocation9 + $0xc0] sm:$0xff] }
  0x58   : > { %476 = vmatpush.xpose.msra.mxu1 %v419_v19  ;;  %494 = vmatpush.xpose.msra.mxu2 %v437_v44  ;;  %v428_v14 = vld [vmem:[#allocation8 + $0x110] sm:$0xff]  ;;  %v550_v16 = vld [vmem:[#allocation9 + $0x140] sm:$0xff]  ;;  %v427_v17 = vld [vmem:[#allocation8 + $0x108] sm:$0xff] }
  0x59   : > { %572 = vmatpush.xpose.msra.mxu3 %v519_v23  ;;  %v533_v18 = vld [vmem:[#allocation9 + $0xb8] sm:$0xff]  ;;  %v426_v20 = vld [vmem:[#allocation8 + $0x100] sm:$0xff]  ;;  %v531_v23 = vld [vmem:[#allocation9 + $0xa8] sm:$0xff] }
  0x5a   : > { %v549_v19 = vld [vmem:[#allocation9 + $0x138] sm:$0xff]  ;;  %v543_v32 = vld [vmem:[#allocation9 + $0x108] sm:$0xff]  ;;  %v558_v36 = vld [vmem:[#allocation11] sm:$0x7] }
  0x5b   : > { %457 = vmatpush.xpose.msra.mxu0 %v402_v21  ;;  %v532_v21 = vld [vmem:[#allocation9 + $0xb0] sm:$0xff]  ;;  %v545_v28 = vld [vmem:[#allocation9 + $0x118] sm:$0xff] }
  0x5c   : > { %477 = vmatpush.xpose.msra.mxu1 %v418_v22  ;;  %495 = vmatpush.xpose.msra.mxu2 %v436_v48  ;;  %v548_v22 = vld [vmem:[#allocation9 + $0x130] sm:$0xff] }
  0x5d   : > { %573 = vmatpush.xpose.msra.mxu3 %v518_v26  ;;  %v546_v26 = vld [vmem:[#allocation9 + $0x120] sm:$0xff] }
  0x5f   : > { %458 = vmatpush.xpose.msra.mxu0 %v401_v24  ;;  %v547_v24 = vld [vmem:[#allocation9 + $0x128] sm:$0xff] }
  0x60   : > { %478 = vmatpush.xpose.msra.mxu1 %v417_v25  ;;  %496 = vmatpush.xpose.msra.mxu2 %v435_v52  ;;  %v530_v25 = vld [vmem:[#allocation9 + $0xa0] sm:$0xff] }
  0x61   : > { %574 = vmatpush.xpose.msra.mxu3 %v517_v30  ;;  %v544_v30 = vld [vmem:[#allocation9 + $0x110] sm:$0xff] }
  0x63   : > { %459 = vmatpush.xpose.msra.mxu0 %v400_v27  ;;  %v529_v27 = vld [vmem:[#allocation9 + $0x98] sm:$0xff] }
  0x64   : > { %479 = vmatpush.xpose.msra.mxu1 %v416_v29  ;;  %497 = vmatpush.xpose.msra.mxu2 %v434_v57  ;;  %v528_v29 = vld [vmem:[#allocation9 + $0x90] sm:$0xff] }
  0x65   : > { %575 = vmatpush.xpose.msra.mxu3 %v516_v34  ;;  %v542_v34 = vld [vmem:[#allocation9 + $0x100] sm:$0xff] }
  0x67   : > { %460 = vmatpush.xpose.msra.mxu0 %v399_v31  ;;  %v527_v31 = vld [vmem:[#allocation9 + $0x88] sm:$0xff] }
  0x68   : > { %480 = vmatpush.xpose.msra.mxu1 %v415_v33  ;;  %498 = vmatpush.xpose.msra.mxu2 %v433_v61  ;;  %v526_v33 = vld [vmem:[#allocation9 + $0x80] sm:$0xff] }
  0x69   : > { %576 = vmatpush.xpose.msra.mxu3 %v515_v38  ;;  %v560_v38 = vperm.slane %v558_v36, 0 }
  0x6b   : > { %461 = vmatpush.xpose.msra.mxu0 %v398_v35  ;;  %v442_v35 = vld [vmem:[%s1508_s4] sm:$0x7] }
  0x6c   : > { %481 = vmatpush.xpose.msra.mxu1 %v414_v37  ;;  %499 = vmatpush.xpose.msra.mxu2 %v432_v2  ;;  %v444_v37 = vperm.slane %v442_v35, 0  ;;  %v445_v48 = vperm.slane %v442_v35, 1 }
  0x6d   : > { %577 = vmatpush.xpose.msra.mxu3 %v514_v42 }
  0x6f   : > { %462 = vmatpush.xpose.msra.mxu0 %v397_v39 }
  0x70   : > { %482 = vmatpush.xpose.msra.mxu1 %v413_v41  ;;  %500 = vmatpush.xpose.msra.mxu2 %v431_v5 }
  0x71   : > { %578 = vmatpush.xpose.msra.mxu3 %v513_v46 }
  0x73   : > { %463 = vmatpush.xpose.msra.mxu0 %v396_v43 }
  0x74   : > { %483 = vmatpush.xpose.msra.mxu1 %v412_v45  ;;  %501 = vmatpush.xpose.msra.mxu2 %v430_v8  ;;  %v446_v8 = vperm.slane %v442_v35, 2 }
  0x75   : > { %579 = vmatpush.xpose.msra.mxu3 %v512_v50 }
  0x77   : > { %464 = vmatpush.xpose.msra.mxu0 %v395_v47 }
  0x78   : > { %484 = vmatpush.xpose.msra.mxu1 %v411_v49  ;;  %502 = vmatpush.xpose.msra.mxu2 %v429_v11 }
  0x79   : > { %580 = vmatpush.xpose.msra.mxu3 %v511_v56 }
  0x7b   : > { %465 = vmatpush.xpose.msra.mxu0 %v394_v51  ;;  %v561_v51 = vperm.slane %v558_v36, 1 }
  0x7c   : > { %485 = vmatpush.xpose.msra.mxu1 %v410_v54  ;;  %503 = vmatpush.xpose.msra.mxu2 %v428_v14 }
  0x7d   : > { %581 = vmatpush.xpose.msra.mxu3 %v510_v60 }
  0x7e   : > { %466 = vmatmul.f32.vlgmr.msra.gmra.mxu0 %v393_v1 }
  0x7f   : > { %586 = vmatpush.xpose.msrb.mxu0 %v541_v53  ;;  %486 = vmatmul.f32.vlgmr.msra.gmra.mxu1 %v393_v1 }
  0x80   : > { %606 = vmatpush.xpose.msrb.mxu1 %v557_v55  ;;  %582 = vmatmul.f32.vlgmr.msra.gmra.mxu3 %v1446_v63 }
  0x81   : > { %504 = vmatpush.xpose.msra.mxu2 %v427_v17 }
  0x83   : > { %587 = vmatpush.xpose.msrb.mxu0 %v540_v58 }
  0x84   : > { %607 = vmatpush.xpose.msrb.mxu1 %v556_v59 }
  0x85   : > { %505 = vmatpush.xpose.msra.mxu2 %v426_v20 }
  0x87   : > { %588 = vmatpush.xpose.msrb.mxu0 %v539_v62 }
  0x88   : > { %608 = vmatpush.xpose.msrb.mxu1 %v555_v0  ;;  %506 = vmatmul.f32.vlgmr.msra.gmra.mxu2 %v393_v1  ;;  %v562_v1 = vperm.slane %v558_v36, 2 }
  0x8b   : > { %589 = vmatpush.xpose.msrb.mxu0 %v538_v3 }
  0x8c   : > { %609 = vmatpush.xpose.msrb.mxu1 %v554_v4 }
  0x8f   : > { %590 = vmatpush.xpose.msrb.mxu0 %v537_v6 }
  0x90   : > { %610 = vmatpush.xpose.msrb.mxu1 %v553_v7 }
  0x93   : > { %591 = vmatpush.xpose.msrb.mxu0 %v536_v9 }
  0x94   : > { %611 = vmatpush.xpose.msrb.mxu1 %v552_v10 }
  0x97   : > { %592 = vmatpush.xpose.msrb.mxu0 %v535_v12 }
  0x98   : > { %612 = vmatpush.xpose.msrb.mxu1 %v551_v13 }
  0x9b   : > { %593 = vmatpush.xpose.msrb.mxu0 %v534_v15 }
  0x9c   : > { %613 = vmatpush.xpose.msrb.mxu1 %v550_v16 }
  0x9f   : > { %594 = vmatpush.xpose.msrb.mxu0 %v533_v18 }
  0xa0   : > { %614 = vmatpush.xpose.msrb.mxu1 %v549_v19 }
  0xa3   : > { %595 = vmatpush.xpose.msrb.mxu0 %v532_v21 }
  0xa4   : > { %615 = vmatpush.xpose.msrb.mxu1 %v548_v22 }
  0xa7   : > { %596 = vmatpush.xpose.msrb.mxu0 %v531_v23 }
  0xa8   : > { %616 = vmatpush.xpose.msrb.mxu1 %v547_v24 }
  0xab   : > { %597 = vmatpush.xpose.msrb.mxu0 %v530_v25 }
  0xac   : > { %617 = vmatpush.xpose.msrb.mxu1 %v546_v26 }
  0xaf   : > { %598 = vmatpush.xpose.msrb.mxu0 %v529_v27 }
  0xb0   : > { %618 = vmatpush.xpose.msrb.mxu1 %v545_v28 }
  0xb3   : > { %599 = vmatpush.xpose.msrb.mxu0 %v528_v29 }
  0xb4   : > { %619 = vmatpush.xpose.msrb.mxu1 %v544_v30 }
  0xb7   : > { %600 = vmatpush.xpose.msrb.mxu0 %v527_v31 }
  0xb8   : > { %620 = vmatpush.xpose.msrb.mxu1 %v543_v32 }
  0xbb   : > { %601 = vmatpush.xpose.msrb.mxu0 %v526_v33 }
  0xbc   : > { %621 = vmatpush.xpose.msrb.mxu1 %v542_v34 }
  0xbe   : > { %602 = vmatmul.f32.vlgmr.msrb.gmra.mxu0 %v1446_v63 }
  0xbf   : > { %622 = vmatmul.f32.vlgmr.msrb.gmra.mxu1 %v1446_v63 }
  0xfb   : > { %v467_v39 = vpop.f32.mrf.mxu0 }
  0xfc   : > { %v468_v41 = vadd.f32 %v467_v39, %v444_v37  ;;  %v487_v49 = vpop.f32.mrf.mxu1 }
  0xfd   : > { %v488_v52 = vadd.f32 %v487_v49, %v445_v48 }
 0x103   : > { %v583_v40 = vpop.f32.mrf.mxu3 }
 0x104   : > { %v584_v42 = vadd.f32 %v583_v40, %v560_v38 }
 0x106   : > { %v626_v43 = vadd.f32 %v584_v42, %v468_v41 }
 0x108   : > { %v627_v44 = vsub.f32 0.0, %v626_v43 }
 0x10a   : > { %v628_v45 = vmul.f32 1.442695, %v627_v44 }
 0x10b   : > { %v507_v10 = vpop.f32.mrf.mxu2 }
 0x10c   : > { %977 = vpow2.f32 %v628_v45  ;;  %v508_v12 = vadd.f32 %v507_v10, %v446_v8 }
 0x112   : > { %v978_v46 = vpop.eup %977 }
 0x113   : > { %v630_v47 = vadd.f32 1.0, %v978_v46 }
 0x115   : > { %979 = vrcp.f32 %v630_v47  ;;  %vm636_vm0 = vweird.f32 %v630_v47  ;;  %v642_v61 = vand.u32 2147483648, %v630_v47  ;;  %v640_v0 = vand.u32 2147483647, %v630_v47 }
 0x117   : > { %v643_v4 = vor.u32 1.1754944e-38, %v642_v61  ;;  %vm641_vm3 = vcmp.eq.f32.partialorder %v640_v0, 8.507059e+37 }
 0x11b   : > { %v980_v50 = vpop.eup %979 }
 0x11c   : > { %v632_v54 = vmul.f32 %v980_v50, %v630_v47  ;;  %vm637_vm1 = vweird.f32 %v980_v50 }
 0x11d   : > { %vm638_vm2 = vmor %vm636_vm0, %vm637_vm1 }
 0x11e   : > { %v633_v57 = vsub.f32 1.0, %v632_v54 }
 0x120   : > { %v634_v60 = vmul.f32 %v980_v50, %v633_v57 }
 0x122   : > { %v635_v62 = vadd.f32 %v980_v50, %v634_v60 }
 0x124   : > { %v639_v6 = vsel %vm638_vm2, %v980_v50, %v635_v62 }
 0x125   : > { %v644_v9 = vsel %vm641_vm3, %v643_v4, %v639_v6 }
 0x13b   : > { %v603_v53 = vpop.f32.mrf.mxu0 }
 0x13c   : > { %v604_v55 = vadd.f32 %v603_v53, %v561_v51  ;;  %v623_v3 = vpop.f32.mrf.mxu1 }
 0x13d   : > { %v624_v7 = vadd.f32 %v623_v3, %v562_v1 }
 0x13e   : > { %v646_v56 = vadd.f32 %v604_v55, %v488_v52 }
 0x13f   : > { %v666_v11 = vmul.f32 %v644_v9, %v624_v7 }
 0x140   : > { %v647_v58 = vsub.f32 0.0, %v646_v56 }
 0x141   : > { %v667_v15 = vadd.f32 %v666_v11, %v508_v12 }
 0x142   : > { %v648_v59 = vmul.f32 1.442695, %v647_v58 }
 0x144   : > { %981 = vpow2.f32 %v648_v59 }
 0x14a   : > { %v982_v2 = vpop.eup %981 }
 0x14b   : > { %v650_v5 = vadd.f32 1.0, %v982_v2 }
 0x14d   : > { %983 = vrcp.f32 %v650_v5  ;;  %v662_v17 = vand.u32 2147483648, %v650_v5  ;;  %v660_v19 = vand.u32 2147483647, %v650_v5  ;;  %vm656_vm5 = vweird.f32 %v650_v5 }
 0x14e   : > { %985 = vtanh.f32 %v667_v15 }
 0x14f   : > { %v663_v21 = vor.u32 1.1754944e-38, %v662_v17  ;;  %vm661_vm7 = vcmp.eq.f32.partialorder %v660_v19, 8.507059e+37 }
 0x153   : > { %v984_v13 = vpop.eup %983 }
 0x154   : > { %v652_v14 = vmul.f32 %v984_v13, %v650_v5  ;;  %vm657_vm4 = vweird.f32 %v984_v13  ;;  %v986_v25 = vpop.eup %985 }
 0x155   : > { %vm658_vm6 = vmor %vm656_vm5, %vm657_vm4 }
 0x156   : > { %v653_v16 = vsub.f32 1.0, %v652_v14 }
 0x158   : > { %v654_v18 = vmul.f32 %v984_v13, %v653_v16 }
 0x15a   : > { %v655_v20 = vadd.f32 %v984_v13, %v654_v18 }
 0x15c   : > { %v659_v22 = vsel %vm658_vm6, %v984_v13, %v655_v20 }
 0x15d   : > { %v664_v23 = vsel %vm661_vm7, %v663_v21, %v659_v22 }
 0x15e   : > { %v669_v24 = vsub.f32 1.0, %v664_v23  ;;  %v671_v27 = vmul.f32 %v664_v23, %v1446_v63 }
 0x160   : > { %v670_v26 = vmul.f32 %v986_v25, %v669_v24 }
 0x162   : > { %v672_v28 = vadd.f32 %v671_v27, %v670_v26 }
 0x164   : > { %673 = vst [vmem:[#allocation2] sm:$0xff] %v672_v28 }
 0x165   : > { %674 = vst [vmem:[%s1443_s1] sm:$0xff] %v672_v28 }
 0x166   : > { %1164 = shalt.err (!%p1161_p0)
}
 0x167   : > { %883 = dma.vmem_to_hbm [thread:$0]  (%p1405_p13), %s691_s16, 128, %s693_s19, %s677_s14   ;;  %675 = vst [vmem:[#allocation13] sm:$0xff] %v672_v28 }
 0x168   : > { %885 = dma.vmem_to_hbm [thread:$0]  (%p1393_p10), %s705_s21, 128, %s707_s17, [#allocation14]  }
 0x169   : > { %1230 = dma.done.wait (%p1393_p10), [#allocation14], 128  }
 0x16a   : > { %1232 = vsyncadd (%p1393_p10), [#allocation14], 4294967168 }
 0x16b PF: > { %p921_p2 = scmp.ge.s32.totalorder %s1259_s29, 2  ;;  %s723_s22 = sand.u32 1, %s1239_s24  }
 0x16c   : > { %s724_s10 = scalar_lea.sflag [#allocation5], %s723_s22 }
 0x16d   : > { %p907_p5 = pnand %p921_p2, %p1412_p4 }
 0x16f   : > { %p908_p6 = pneg %p907_p5 }
 0x171   : > { %1234 = dma.done.wait (%p908_p6), %s724_s10, 128  }
 0x172   : > { %1236 = vsyncadd (%p908_p6), %s724_s10, 4294967168  ;;  %s27_s29 = sadd.s32 1, %s1259_s29   ;;  %s1525_s24 = smov %s1243_s25 }
 0x173   : > { %p24_p13 = scmp.ge.s32.totalorder %s27_s29, 10   ;;  %s1526_s25 = smov %s1247_s26 }
 0x174   : > { %s1527_s26 = smov %s1410_s13  ;;  %s1528_s27 = smov %s1255_s28 }
 0x175   : > { %s1529_s28 = smov %s1531_s18  ;;  %26 = sbr.rel (!%p24_p13) target bundleno = 13 (0xd), region = 119 }
 0x17a   :  { %730 = vsyncpa [#allocation4], 1 }
 0x17b   :  { %732 = vsyncpa [#allocation4 + $0x1], 1 }
 0x17c   :  { %733 = vsyncpa [#allocation7], 1 }
 0x17d   :  { %734 = vsyncpa [#allocation10], 1 }
 0x17e   :  { %735 = vsyncpa [#allocation5], 1 }
 0x17f   :  { %737 = vsyncpa [#allocation5 + $0x1], 1 }
 0x180   :  { %738 = vsyncpa [#allocation14], 1 }

</bundles_post_ra>
